<compile_context>
chip_gen: v6e
topology: v6e:2x2x1
jax: 0.10.0
libtpu: 0.0.40
codegen_flags: <defaults>
</compile_context>

<pallas_src>
import functools

import jax
import jax.numpy as jnp
from jax import lax
from jax.experimental import pallas as pl
from jax.experimental.pallas import tpu as pltpu

_EPS = 1e-5  # torch.nn.InstanceNorm2d default eps


def _conv_in_relu_kernel(p_ref, w_ref, o_ref, *, samples_per_step, spatial):
    """Fused conv-matmul + InstanceNorm2d + ReLU for a block of samples.

    p_ref: (KKC, B*P) bf16   im2col patches, B samples lane-concatenated
    w_ref: (C_out, KKC) bf16 reshaped conv weight
    o_ref: (B, C_out, P)     output activations (per-sample lane-dense stores)
    """
    # One wide MXU matmul per grid step, f32 accumulation.
    y = jnp.dot(w_ref[...], p_ref[...],
                preferred_element_type=jnp.float32)          # (C_out, B*P) f32

    inv_p = 1.0 / float(spatial)
    for b in range(samples_per_step):                        # static unroll, B small
        yb = y[:, b * spatial:(b + 1) * spatial]             # 128-aligned static slice
        # One-pass stats: the two reductions are independent (no center pass).
        s1 = jnp.sum(yb, axis=-1, keepdims=True)
        s2 = jnp.sum(yb * yb, axis=-1, keepdims=True)
        mean = s1 * inv_p
        var = jnp.maximum(s2 * inv_p - mean * mean, 0.0)     # biased, like torch
        inv_std = lax.rsqrt(var + _EPS)                      # EUP slot
        # Normalize + ReLU fused into the lane-dense store.
        o_ref[b] = jnp.maximum((yb - mean) * inv_std, 0.0).astype(o_ref.dtype)


def _pick_samples_per_step(n, p, kkc, c_out):
    """Samples per grid step: big enough to amortize step overhead, small
    enough to keep >=2 parallel steps (v7x 2xTC) and fit scoped VMEM."""
    if p % 128 != 0:
        return 1  # per-sample lane slices must stay 128-aligned
    # Double-buffered bf16 patches in + f32 activations out, per sample.
    per_sample = 2 * (kkc * p * 2) + 2 * (c_out * p * 4)
    budget = 12 * 1024 * 1024          # well under the 32 MiB scoped default
    max_vmem = max(1, budget // max(per_sample, 1))
    max_cores = n // 2 if n >= 2 else 1   # keep >=2 grid steps when possible
    want = max(1, 2048 // p)              # ~2048-lane matmul N is past the knee
    cap = max(1, min(want, max_vmem, max_cores))
    bb = 1
    for d in range(1, min(cap, n) + 1):   # largest divisor of n <= cap
        if n % d == 0:
            bb = d
    return bb


def _im2col_lane_concat(x_pad, k, stride, h_out, w_out):
    """(N,C,Hp,Wp) -> (K*K*C, N*P): tap-major/channel-minor rows, samples
    concatenated along the lane axis (spatial-minor within each sample)."""
    n, c, _, _ = x_pad.shape
    p = h_out * w_out
    x_cf = jnp.transpose(x_pad, (1, 0, 2, 3))   # (C, N, Hp, Wp) — 1x-size transpose
    taps = []
    for kh in range(k):
        for kw in range(k):
            sl = lax.slice(
                x_cf, (0, 0, kh, kw),
                (c, n, kh + (h_out - 1) * stride + 1,
                 kw + (w_out - 1) * stride + 1),
                (1, 1, stride, stride))
            taps.append(sl.reshape(c, n * p))
    return jnp.concatenate(taps, axis=0)        # (KKC, N*P)


def _im2col_sample_major(x_pad, k, stride, h_out, w_out):
    """(N,C,Hp,Wp) -> (N, K*K*C, P) — fallback layout when P % 128 != 0."""
    n, c, _, _ = x_pad.shape
    p = h_out * w_out
    taps = []
    for kh in range(k):
        for kw in range(k):
            sl = lax.slice(
                x_pad, (0, 0, kh, kw),
                (n, c, kh + (h_out - 1) * stride + 1,
                 kw + (w_out - 1) * stride + 1),
                (1, 1, stride, stride))
            taps.append(sl.reshape(n, c, p))
    return jnp.concatenate(taps, axis=1)        # (N, KKC, P)


@functools.partial(jax.jit, static_argnames=("stride",))
def conv_instnorm_relu(x, weight, *, stride):
    """Conv2d(reflect pad k//2, stride) + InstanceNorm2d + ReLU, NCHW.

    The conv bias is intentionally absent: it is cancelled exactly by the
    InstanceNorm mean subtraction.
    """
    n, c_in, h, w = x.shape
    c_out, c_in_w, k, k2 = weight.shape
    assert c_in_w == c_in and k == k2
    pad = k // 2
    x_pad = x if pad == 0 else jnp.pad(
        x, ((0, 0), (0, 0), (pad, pad), (pad, pad)), mode="reflect")
    h_out = (h + 2 * pad - k) // stride + 1
    w_out = (w + 2 * pad - k) // stride + 1
    p = h_out * w_out
    kkc = k * k * c_in

    # (co, kh, kw, ci) flattening matches the tap-major/channel-minor patches.
    w_mat = jnp.transpose(weight, (0, 2, 3, 1)).reshape(c_out, kkc)
    w_mat = w_mat.astype(jnp.bfloat16)

    bb = _pick_samples_per_step(n, p, kkc, c_out)
    if p % 128 == 0:
        # Main path: samples lane-concatenated, one wide matmul per step.
        patches = _im2col_lane_concat(x_pad, k, stride, h_out, w_out)
        patches = patches.astype(jnp.bfloat16)                     # (KKC, N*P)
        patches_spec = pl.BlockSpec((kkc, bb * p), lambda i: (0, i))
    else:
        # Fallback: one sample per step (masked stores; see TODO above).
        bb = 1
        patches = _im2col_sample_major(x_pad, k, stride, h_out, w_out)
        patches = patches.astype(jnp.bfloat16)                     # (N, KKC, P)
        patches_spec = pl.BlockSpec((None, kkc, p), lambda i: (i, 0, 0))

    out = pl.pallas_call(
        functools.partial(_conv_in_relu_kernel,
                          samples_per_step=bb, spatial=p),
        out_shape=jax.ShapeDtypeStruct((n, c_out, p), x.dtype),
        grid=(n // bb,),
        in_specs=[
            patches_spec,
            pl.BlockSpec((c_out, kkc), lambda i: (0, 0)),
        ],
        out_specs=pl.BlockSpec((bb, c_out, p), lambda i: (i, 0, 0)),
        compiler_params=pltpu.CompilerParams(
            dimension_semantics=("parallel",),   # steps split across v7x's 2 TCs
        ),
    )(patches, w_mat)

    return out.reshape(n, c_out, h_out, w_out)   # free: layout already (N,C,P)


class ConvBlock:
    """Pallas equivalent of the PyTorch ConvBlock module (forward semantics)."""

    def __init__(self, skip_connection, num_input, num_output, kernel_size,
                 kernel_stride, *, key):
        self.skip_connection = skip_connection
        self.kernel_stride = kernel_stride
        k_w, k_b = jax.random.split(key)
        fan_in = num_input * kernel_size * kernel_size
        bound = 1.0 / (fan_in ** 0.5)  # torch Conv2d default init range
        self.weight = jax.random.uniform(
            k_w, (num_output, num_input, kernel_size, kernel_size),
            jnp.float32, -bound, bound)
        # Kept for parameter parity with nn.Conv2d(bias=True); mathematically a
        # no-op under InstanceNorm2d(affine=False), so never fed to the kernel.
        self.bias = jax.random.uniform(
            k_b, (num_output,), jnp.float32, -bound, bound)

    def __call__(self, inputs):
        x, skip_list, index = inputs
        y = conv_instnorm_relu(x, self.weight, stride=self.kernel_stride)
        if self.skip_connection:
            skip_list.append(y)
            index += 1
        return (y, skip_list, index)


def _reference(x, weight, bias, stride):
    """Pure-JAX reference with matching precision (bf16 operands, f32 acc).

    Includes the conv bias so the check also verifies that dropping it in the
    kernel is exact under InstanceNorm.
    """
    pad = weight.shape[-1] // 2
    xp = x if pad == 0 else jnp.pad(
        x, ((0, 0), (0, 0), (pad, pad), (pad, pad)), mode="reflect")
    y = lax.conv_general_dilated(
        xp.astype(jnp.bfloat16), weight.astype(jnp.bfloat16),
        (stride, stride), "VALID",
        dimension_numbers=("NCHW", "OIHW", "NCHW"),
        preferred_element_type=jnp.float32)
    y = y + bias.reshape(1, -1, 1, 1)
    m = jnp.mean(y, axis=(2, 3), keepdims=True)
    v = jnp.mean(jnp.square(y - m), axis=(2, 3), keepdims=True)
    y = (y - m) * lax.rsqrt(v + _EPS)
    return jnp.maximum(y, 0.0)


if __name__ == "__main__":
    key = jax.random.PRNGKey(0)
    k_x, k_p = jax.random.split(key)

    n, c_in, h, w = 2, 4, 16, 16
    c_out, ksize, kstride = 8, 3, 1

    x = jax.random.normal(k_x, (n, c_in, h, w), dtype=jnp.float32)
    block = ConvBlock(skip_connection=True, num_input=c_in, num_output=c_out,
                      kernel_size=ksize, kernel_stride=kstride, key=k_p)

    y, skip_list, index = block((x, [], 0))
    y = jax.block_until_ready(y)

    assert y.shape == (n, c_out, h, w) and y.dtype == x.dtype
    assert len(skip_list) == 1 and skip_list[0] is y and index == 1

    ref = _reference(x, block.weight, block.bias, kstride)
    max_err = float(jnp.max(jnp.abs(y - ref)))
    assert max_err < 1e-2, f"mismatch vs reference: max abs err {max_err}"

    print("KERNEL_OK")
</pallas_src>

<mosaic_0001>
module attributes {stable_mosaic.version = 11 : i64} {
  func.func @_conv_in_relu_kernel(%arg0: i32, %arg1: memref<36x256xbf16, #tpu.memory_space<vmem>>, %arg2: memref<8x36xbf16, #tpu.memory_space<vmem>>, %arg3: memref<1x8x256xf32, #tpu.memory_space<vmem>>) attributes {dimension_semantics = [#tpu.dimension_semantics<parallel>], iteration_bounds = array<i64: 2>, scalar_prefetch = 0 : i64, scratch_operands = 0 : i64, tpu.core_type = #tpu.core_type<tc>, window_params = [{transform_indices = @transform_0, window_bounds = array<i64: 36, 256>}, {pipeline_mode = #tpu.pipeline_mode<synchronous>, transform_indices = @transform_1, window_bounds = array<i64: 8, 36>}, {transform_indices = @transform_2, window_bounds = array<i64: 1, 8, 256>}]} {
    %c0 = arith.constant 0 : index
    %c0_0 = arith.constant 0 : index
    %0 = vector.load %arg2[%c0, %c0_0] : memref<8x36xbf16, #tpu.memory_space<vmem>>, vector<8x36xbf16>
    %c0_1 = arith.constant 0 : index
    %c0_2 = arith.constant 0 : index
    %1 = vector.load %arg1[%c0_1, %c0_2] : memref<36x256xbf16, #tpu.memory_space<vmem>>, vector<36x256xbf16>
    %cst = arith.constant dense<0.000000e+00> : vector<8x256xf32>
    %2 = tpu.matmul %0, %1, %cst {dimension_numbers = #tpu.dot_dimension_numbers<[1], [0], [0], [1], [0, 0, 1, 1], [], []>} : vector<8x36xbf16>, vector<36x256xbf16>, vector<8x256xf32> -> vector<8x256xf32>
    %cst_3 = arith.constant dense<0.000000e+00> : vector<8xf32>
    %3 = vector.multi_reduction <add>, %2, %cst_3 [1] : vector<8x256xf32> to vector<8xf32>
    %4 = vector.shape_cast %3 : vector<8xf32> to vector<8x1xf32>
    %5 = arith.mulf %2, %2 : vector<8x256xf32>
    %cst_4 = arith.constant dense<0.000000e+00> : vector<8xf32>
    %6 = vector.multi_reduction <add>, %5, %cst_4 [1] : vector<8x256xf32> to vector<8xf32>
    %7 = vector.shape_cast %6 : vector<8xf32> to vector<8x1xf32>
    %cst_5 = arith.constant 3.906250e-03 : f32
    %8 = vector.broadcast %cst_5 : f32 to vector<8x1xf32>
    %9 = arith.mulf %4, %8 : vector<8x1xf32>
    %cst_6 = arith.constant 3.906250e-03 : f32
    %10 = vector.broadcast %cst_6 : f32 to vector<8x1xf32>
    %11 = arith.mulf %7, %10 : vector<8x1xf32>
    %12 = arith.mulf %9, %9 : vector<8x1xf32>
    %13 = arith.subf %11, %12 : vector<8x1xf32>
    %cst_7 = arith.constant 0.000000e+00 : f32
    %14 = vector.broadcast %cst_7 : f32 to vector<8x1xf32>
    %15 = arith.maximumf %13, %14 : vector<8x1xf32>
    %cst_8 = arith.constant 9.99999974E-6 : f32
    %16 = vector.broadcast %cst_8 : f32 to vector<8x1xf32>
    %17 = arith.addf %15, %16 : vector<8x1xf32>
    %18 = math.rsqrt %17 : vector<8x1xf32>
    %19 = vector.broadcast %9 : vector<8x1xf32> to vector<8x256xf32>
    %20 = arith.subf %2, %19 : vector<8x256xf32>
    %21 = vector.broadcast %18 : vector<8x1xf32> to vector<8x256xf32>
    %22 = arith.mulf %20, %21 : vector<8x256xf32>
    %cst_9 = arith.constant 0.000000e+00 : f32
    %23 = vector.broadcast %cst_9 : f32 to vector<8x256xf32>
    %24 = arith.maximumf %22, %23 : vector<8x256xf32>
    %c0_10 = arith.constant 0 : index
    %c0_11 = arith.constant 0 : index
    %c0_12 = arith.constant 0 : index
    %25 = vector.load %arg3[%c0_10, %c0_11, %c0_12] : memref<1x8x256xf32, #tpu.memory_space<vmem>>, vector<1x8x256xf32>
    %26 = vector.shape_cast %25 : vector<1x8x256xf32> to vector<8x256xf32>
    %27 = vector.shape_cast %24 : vector<8x256xf32> to vector<1x8x256xf32>
    tpu.vector_store %arg3[%c0_10, %c0_11, %c0_12], %27 {strides = array<i32>} : memref<1x8x256xf32, #tpu.memory_space<vmem>>, vector<1x8x256xf32>,
    return
  }
  func.func @transform_0(%arg0: i32) -> (i32, i32) {
    %c0_i32 = arith.constant 0 : i32
    %c0_i32_0 = arith.constant 0 : i32
    return %c0_i32, %arg0 : i32, i32
  }
  func.func @transform_1(%arg0: i32) -> (i32, i32) {
    %c0_i32 = arith.constant 0 : i32
    %c0_i32_0 = arith.constant 0 : i32
    %c0_i32_1 = arith.constant 0 : i32
    return %c0_i32, %c0_i32_0 : i32, i32
  }
  func.func @transform_2(%arg0: i32) -> (i32, i32, i32) {
    %c0_i32 = arith.constant 0 : i32
    %c0_i32_0 = arith.constant 0 : i32
    %c0_i32_1 = arith.constant 0 : i32
    return %arg0, %c0_i32, %c0_i32_0 : i32, i32, i32
  }
}

</mosaic_0001>

<bundles_post_ra>
// kernel: conv_instnorm_relu.1
= control target key start
LH: loop header
LB: loop body
LE: loop exit
PB: predicated region body
PF: predicated region fallthrough
CT: control target
= control target key end

     0   :  { %s463_s9 = smov 0   ;;  %s465_s10 = smov 0   ;;  %s520_s0 = inlined_call_operand.vmem [shape: bf16[36,512], index: 0, kind: input, shape index: {}]   ;;  %s521_s1 = inlined_call_operand.vmem [shape: bf16[8,36], index: 1, kind: input, shape index: {}]   ;;  %s522_s2 = inlined_call_operand.vmem [shape: f32[2,8,256], index: 2, kind: output, shape index: {}]  }
   0x1   :  { %s467_s11 = smov 0  }
   0x2 LB: > { %s365_s12 = sadd.s32 4294967295, %s445_s11   ;;  %s480_s13 = sadd.s32 1, %s445_s11   ;;  %s445_s11 = sphi %s467_s11, %s525_s11   ;;  %s441_s10 = sphi %s465_s10, %s524_s10   ;;  %s437_s9 = sphi %s463_s9, %s523_s9  }
   0x3   : > { %s16_s14 = ssub.s32 %s445_s11, %s480_s13  ;;  %s19_s15 = sadd.s32 1, %s441_s10 }
   0x4   : > { %p17_p0 = scmp.eq.s32.totalorder %s16_s14, 0  ;;  %p26_p1 = scmp.ne.s32.totalorder %s441_s10, %s437_s9 }
   0x5   : > { %p27_p2 = scmp.eq.s32.totalorder %s445_s11, 0  ;;  %p368_p4 = scmp.ge.s32.totalorder %s445_s11, 2 }
   0x6   : > { %s489_s16 = scalar_select %p17_p0, %s441_s10, %s19_s15  }
   0x7   : > { %p28_p3 = por %p27_p2, %p26_p1  ;;  %102 = sbr.rel (%p368_p4) target bundleno = 19 (0x13), region = 20 }
   0xc   : > { %105 = sbr.rel (!%p28_p3) target bundleno = 19 (0x13), region = 24  ;;  %s107_s17 = sand.u32 (%p28_p3), 1, %s441_s10  }
   0xd   : > { %s384_s18 = sshll.u32 (%p28_p3), %s445_s11, 3  ;;  %s386_s19 = smul.u32 (%p28_p3), 40, %s107_s17 }
   0xe   : > { %s112_s22 = scalar_lea.vmem (%p28_p3), %s520_s0, %s384_s18 }
   0xf   : > { %v149_v0 = vld [vmem:[%s112_s22] sm:$0xff] (%p28_p3)  ;;  %v151_v1 = vld [vmem:[%s112_s22 + $0x10] sm:$0xff] (%p28_p3)  ;;  %s109_s23 = scalar_lea.vmem (%p28_p3), [#allocation2], %s386_s19 }
  0x10   : > { %v153_v2 = vld [vmem:[%s112_s22 + $0x20] sm:$0xff] (%p28_p3)  ;;  %v155_v3 = vld [vmem:[%s112_s22 + $0x30] sm:$0xff] (%p28_p3)  ;;  %150 = vst [vmem:[%s109_s23] sm:$0xff] (%p28_p3), %v149_v0  ;;  %152 = vst [vmem:[%s109_s23 + $0x8] sm:$0xff] (%p28_p3), %v151_v1 }
  0x11   : > { %v157_v4 = vld [vmem:[%s112_s22 + $0x40] sm:$0xff]  ;;  %154 = vst [vmem:[%s109_s23 + $0x10] sm:$0xff] %v153_v2  ;;  %156 = vst [vmem:[%s109_s23 + $0x18] sm:$0xff] %v155_v3 }
  0x12   : > { %158 = vst [vmem:[%s109_s23 + $0x20] sm:$0xff] %v157_v4 }
  0x13 PF: > { %p371_p5 = scmp.ge.s32.totalorder %s445_s11, 1  ;;  %p163_p6 = scmp.lt.s32.totalorder %s445_s11, 3 }
  0x15   : > { %p164_p7 = pnand %p371_p5, %p163_p6 }
  0x16   : > { %s170_s24 = sand.u32 (!%p164_p7), 1, %s437_s9   ;;  %p192_p8 = scmp.lt.s32.totalorder (!%p164_p7), %s365_s12, 1 }
  0x17   : > { %167 = sbr.rel (%p164_p7) target bundleno = 409 (0x199), region = 62 }
  0x18   : > { %s387_s25 = smul.u32 (!%p164_p7), 40, %s170_s24 }
  0x1a   : > { %s172_s26 = scalar_lea.vmem (!%p164_p7), [#allocation2], %s387_s25 }
  0x1c   : > { %v447_v5 = vmov 0   ;;  %v203_v6 = vld [vmem:[%s172_s26 + $0x20] sm:$0x33]  ;;  %vm233_vm0 = vcmask 1041408   ;;  %v415_v9 = vld [vmem:[%s172_s26 + $0x14] ss:$8 sps:$4 sm:$0xff]  }
  0x1d   : > { %272 = vmatprep.mubr.bf16.mxu0 %v447_v5  ;;  %v379_v7 = vcombine.high %v203_v6, %v203_v6  ;;  %v378_v8 = vcombine.low %v203_v6, %v203_v6  ;;  %v417_v11 = vld [vmem:[%s172_s26 + $0x10] ss:$8 sps:$4 sm:$0xff]   ;;  %v418_v12 = vld [vmem:[%s172_s26 + $0x4] ss:$8 sps:$4 sm:$0xff]   ;;  %v420_v13 = vld [vmem:[%s172_s26] ss:$8 sps:$4 sm:$0xff]  }
  0x1e   : > { %v198_v14 = vld [vmem:[%s521_s1] sm:$0xf]  ;;  %vm229_vm1 = vcmask 293888   ;;  %s527_s12 = smov (!%p192_p8, %s365_s12), 1 }
  0x1f   : > { %380 = vmatprep.subr.msk.bf16.mxu0 %vm233_vm0, %v379_v7  ;;  %v235_v10 = vsel %vm233_vm0, %v378_v8, 0  ;;  %s385_s29 = sshll.u32 %s527_s12, 4 }
  0x20   : > { %251 = vmatpush1.bf16.msra.mxu0 %v235_v10  ;;  %s196_s4 = scalar_lea.vmem %s522_s2, %s385_s29 }
  0x21   : > { %252 = vmatprep.subr.bf16.mxu0 %v415_v9 }
  0x24   : > { %253 = vmatpush1.bf16.msra.mxu0 %v417_v11 }
  0x25   : > { %254 = vmatprep.subr.bf16.mxu0 %v418_v12 }
  0x28   : > { %255 = vmatpush1.bf16.msra.mxu0 %v420_v13 }
  0x2b   : > { %381 = vmatmul.mubr.msk.bf16.vlgmr.msra.gmra.mxu0 %vm229_vm1, %v198_v14 }
  0xeb   : > { %v274_v15 = vpop.f32.mrf.mxu0 }
  0xec   : > { %v284_v20 = vmul.f32 %v274_v15, %v274_v15 }
  0xed   : > { %v276_v16 = vpop.f32.mrf.mxu0 }
  0xee   : > { %v281_v17 = vadd.f32 %v276_v16, %v274_v15  ;;  %v285_v18 = vmul.f32 %v276_v16, %v276_v16 }
  0xef   : > { %v278_v19 = vpop.f32.mrf.mxu0 }
  0xf0   : > { %282 = vadd.xlane.f32.xlu0 %v281_v17  ;;  %v286_v22 = vadd.f32 %v285_v18, %v284_v20 }
  0xf1   : > { %v279_v21 = vpop.f32.mrf.mxu0 }
  0xf4   : > { %287 = vadd.xlane.f32.xlu0 %v286_v22 }
 0x179   : > { %v283_v23 = vpop.xlane.xlu0 %282 }
 0x17a   : > { %v289_v24 = vmul.f32 0.00390625, %v283_v23 }
 0x17c   : > { %v291_v26 = vmul.f32 %v289_v24, %v289_v24  ;;  %v296_v31 = vsub.f32 %v274_v15, %v289_v24  ;;  %v297_v32 = vsub.f32 %v276_v16, %v289_v24 }
 0x17d   : > { %v288_v25 = vpop.xlane.xlu0 %287 }
 0x17e   : > { %v290_v27 = vmul.f32 0.00390625, %v288_v25 }
 0x180   : > { %v292_v28 = vsub.f32 %v290_v27, %v291_v26 }
 0x182   : > { %v293_v29 = vmax.f32 %v292_v28, 0.0 }
 0x184   : > { %v294_v30 = vadd.f32 1e-05, %v293_v29 }
 0x186   : > { %421 = vrsqrt.f32 %v294_v30 }
 0x193   : > { %v422_v33 = vpop.eup %421 }
 0x194   : > { %v298_v34 = vmul.f32 %v422_v33, %v296_v31  ;;  %v299_v35 = vmul.f32 %v422_v33, %v297_v32 }
 0x196   : > { %v300_v36 = vmax.f32 %v298_v34, 0.0  ;;  %v301_v37 = vmax.f32 %v299_v35, 0.0 }
 0x198   : > { %302 = vst [vmem:[%s196_s4] sm:$0xff] %v300_v36  ;;  %303 = vst [vmem:[%s196_s4 + $0x8] sm:$0xff] %v301_v37 }
 0x199 PF: > { %p9_p9 = scmp.ge.s32.totalorder %s480_s13, 4   ;;  %s523_s9 = smov %s441_s10 }
 0x19a   : > { %s524_s10 = smov %s489_s16  ;;  %s525_s11 = smov %s480_s13 }
 0x19b   :  { %11 = sbr.rel (!%p9_p9) target bundleno = 2 (0x2), region = 101 }

</bundles_post_ra>
